<compile_context>
chip_gen: v7x
topology: tpu7x:2x2x1
jax: 0.10.0
libtpu: 0.0.40
codegen_flags: <defaults>
</compile_context>

<pallas_src>
import jax
import jax.numpy as jnp
from jax import lax
from jax.experimental import pallas as pl
from jax.experimental.pallas import tpu as pltpu


def _make_kernel(S, E, D, tk, compute_dtype, approx_recip):
    cdt = compute_dtype

    def kernel(x_ref, wq_ref, wk_ref, wv_ref, wo_ref, bo_ref, o_ref,
               q_scr, m_scr, l_scr, acc_scr):
        h = pl.program_id(1)
        kv = pl.program_id(2)
        n_kv = pl.num_programs(2)

        # --- once per batch element: seed the output block with the bias ---
        @pl.when(jnp.logical_and(h == 0, kv == 0))
        def _():
            o_ref[...] = jnp.broadcast_to(bo_ref[...], (S, E)).astype(o_ref.dtype)

        # --- once per (batch, head): project all queries, reset softmax state ---
        @pl.when(kv == 0)
        def _():
            q = jnp.dot(x_ref[...], wq_ref[...],
                        preferred_element_type=jnp.float32)            # (S, D)
            q_scr[...] = q.astype(q_scr.dtype)
            m_scr[...] = jnp.full(m_scr.shape, -jnp.inf, dtype=m_scr.dtype)
            l_scr[...] = jnp.zeros(l_scr.shape, dtype=l_scr.dtype)
            acc_scr[...] = jnp.zeros(acc_scr.shape, dtype=acc_scr.dtype)

        # --- project the current K/V tile (weights already (E, D): no .T) ---
        start = pl.multiple_of(kv * tk, tk)
        x_kv = x_ref[pl.ds(start, tk), :]                               # (tk, E)
        k_t = jnp.dot(x_kv, wk_ref[...],
                      preferred_element_type=jnp.float32).astype(cdt)  # (tk, D)
        v_t = jnp.dot(x_kv, wv_ref[...],
                      preferred_element_type=jnp.float32).astype(cdt)  # (tk, D)

        # --- online softmax over the kv axis (state in f32, no mask/scale) ---
        s = lax.dot_general(q_scr[...], k_t,
                            (((1,), (1,)), ((), ())),
                            preferred_element_type=jnp.float32)        # (S, tk)
        m_new = jnp.maximum(m_scr[...], jnp.max(s, axis=-1, keepdims=True))
        alpha = jnp.exp(m_scr[...] - m_new)
        p = jnp.exp(s - m_new)
        l_scr[...] = alpha * l_scr[...] + jnp.sum(p, axis=-1, keepdims=True)
        acc_scr[...] = alpha * acc_scr[...] + jnp.dot(
            p.astype(cdt), v_t, preferred_element_type=jnp.float32)
        m_scr[...] = m_new

        # --- last kv tile: normalize, project this head, accumulate output ---
        @pl.when(kv == n_kv - 1)
        def _():
            ctx = acc_scr[...] * pl.reciprocal(l_scr[...], approx=approx_recip)
            head_out = jnp.dot(ctx.astype(cdt), wo_ref[...],
                               preferred_element_type=jnp.float32)     # (S, E)
            o_ref[...] = o_ref[...] + head_out.astype(o_ref.dtype)

    return kernel


def gpt_neo_self_attention(hidden_states, wq, wk, wv, wo, bo, *, num_heads,
                           compute_dtype=jnp.bfloat16, kv_tile=None):
    """Fused GPT-Neo self-attention forward.

    hidden_states: (B, S, E).  wq/wk/wv/wo: (E, E) torch nn.Linear layout
    (out, in), bo: (E,).  compute_dtype=float32 reproduces the module exactly;
    bfloat16 is the MXU fast path (f32 accumulation, f32 softmax).
    """
    B, S, E = hidden_states.shape
    if E % num_heads != 0:
        raise ValueError("embed_dim must be divisible by num_heads")
    H = num_heads
    D = E // H
    cdt = compute_dtype

    # kv tile: biggest clean divisor of S up to 512 rows.
    tk = min(S, 512) if kv_tile is None else min(kv_tile, S)
    if S % tk != 0:
        tk = S  # TODO(synk): pad/mask ragged kv tiles instead of falling back.
    n_kv = S // tk

    # One-time XLA-side weight prep: transpose to (in, out) and split per head
    # so the kernel never transposes/reshapes anything.
    def split_in_out(w):  # (E_out, E_in) -> (H, E_in, D)
        return jnp.transpose(w).reshape(E, H, D).transpose(1, 0, 2).astype(cdt)

    wqT = split_in_out(wq)
    wkT = split_in_out(wk)
    wvT = split_in_out(wv)
    woT = jnp.transpose(wo).reshape(H, D, E).astype(cdt)   # (H, D, E)
    x_c = hidden_states.astype(cdt)
    bo2 = bo.reshape(1, E).astype(jnp.float32)

    kernel = _make_kernel(S, E, D, tk, cdt,
                          approx_recip=(cdt != jnp.float32))

    return pl.pallas_call(
        kernel,
        out_shape=jax.ShapeDtypeStruct((B, S, E), hidden_states.dtype),
        grid_spec=pltpu.PrefetchScalarGridSpec(
            num_scalar_prefetch=0,
            grid=(B, H, n_kv),
            in_specs=[
                pl.BlockSpec((None, S, E), lambda b, h, kv: (b, 0, 0)),  # x
                pl.BlockSpec((None, E, D), lambda b, h, kv: (h, 0, 0)),  # WqT[h]
                pl.BlockSpec((None, E, D), lambda b, h, kv: (h, 0, 0)),  # WkT[h]
                pl.BlockSpec((None, E, D), lambda b, h, kv: (h, 0, 0)),  # WvT[h]
                pl.BlockSpec((None, D, E), lambda b, h, kv: (h, 0, 0)),  # WoT[h]
                pl.BlockSpec((1, E), lambda b, h, kv: (0, 0)),           # bias
            ],
            out_specs=pl.BlockSpec((None, S, E), lambda b, h, kv: (b, 0, 0)),
            scratch_shapes=[
                pltpu.VMEM((S, D), cdt),           # q of the current head
                pltpu.VMEM((S, 1), jnp.float32),   # running max
                pltpu.VMEM((S, 1), jnp.float32),   # running denom
                pltpu.VMEM((S, D), jnp.float32),   # unnormalized context
            ],
        ),
        compiler_params=pltpu.CompilerParams(
            dimension_semantics=("parallel", "arbitrary", "arbitrary"),
            vmem_limit_bytes=64 * 1024 * 1024,
        ),
    )(x_c, wqT, wkT, wvT, woT, bo2)


def _reference(hidden_states, wq, wk, wv, wo, bo, *, num_heads,
               compute_dtype=jnp.float32):
    """Plain-JAX reference mirroring the PyTorch forward (eval mode).

    compute_dtype=float32 is exactly the module's math; bfloat16 mirrors the
    kernel's fast-path casting (bf16 MXU inputs, f32 accumulation, f32 softmax).
    """
    B, S, E = hidden_states.shape
    H = num_heads
    D = E // H
    cdt = compute_dtype
    x = hidden_states.astype(cdt)

    def lin(w):
        return jnp.dot(x, w.T.astype(cdt), preferred_element_type=jnp.float32)

    q = lin(wq).astype(cdt)
    k = lin(wk).astype(cdt)
    v = lin(wv).astype(cdt)

    def split(t):
        return t.reshape(B, S, H, D).transpose(0, 2, 1, 3)

    qh, kh, vh = split(q), split(k), split(v)
    scores = jnp.einsum('bhsd,bhtd->bhst', qh, kh,
                        preferred_element_type=jnp.float32)
    attn = jax.nn.softmax(scores, axis=-1)                           # f32
    ctx = jnp.einsum('bhst,bhtd->bhsd', attn.astype(cdt), vh,
                     preferred_element_type=jnp.float32)
    merged = ctx.transpose(0, 2, 1, 3).reshape(B, S, E)
    out = jnp.dot(merged.astype(cdt), wo.T.astype(cdt),
                  preferred_element_type=jnp.float32) + bo.astype(jnp.float32)
    return out.astype(hidden_states.dtype)


if __name__ == "__main__":
    # Small config consistent with the module: hidden=32, heads=4, seq=8, batch=2
    B, S, E, H = 2, 8, 32, 4

    key = jax.random.PRNGKey(0)
    k_x, k_q, k_k, k_v, k_o, k_b = jax.random.split(key, 6)

    x = jax.random.normal(k_x, (B, S, E), dtype=jnp.float32)
    scale = 1.0 / jnp.sqrt(jnp.float32(E))
    wq = jax.random.normal(k_q, (E, E), dtype=jnp.float32) * scale
    wk = jax.random.normal(k_k, (E, E), dtype=jnp.float32) * scale
    wv = jax.random.normal(k_v, (E, E), dtype=jnp.float32) * scale
    wo = jax.random.normal(k_o, (E, E), dtype=jnp.float32) * scale
    bo = jax.random.normal(k_b, (E,), dtype=jnp.float32) * 0.1

    # Exact-module-semantics path (f32 MXU inputs, exact reciprocal).
    out_f32 = gpt_neo_self_attention(x, wq, wk, wv, wo, bo, num_heads=H,
                                     compute_dtype=jnp.float32)
    out_f32 = jax.block_until_ready(out_f32)
    ref_f32 = _reference(x, wq, wk, wv, wo, bo, num_heads=H,
                         compute_dtype=jnp.float32)
    assert out_f32.shape == (B, S, E)
    assert jnp.allclose(out_f32, ref_f32, atol=1e-4, rtol=1e-4), (
        "f32 path max abs err = "
        + str(float(jnp.max(jnp.abs(out_f32 - ref_f32)))))

    # Recommended fast path (bf16 MXU inputs, f32 accumulation, approx recip),
    # checked against a cast-matched reference.
    out_bf16 = gpt_neo_self_attention(x, wq, wk, wv, wo, bo, num_heads=H,
                                      compute_dtype=jnp.bfloat16)
    out_bf16 = jax.block_until_ready(out_bf16)
    ref_bf16 = _reference(x, wq, wk, wv, wo, bo, num_heads=H,
                          compute_dtype=jnp.bfloat16)
    assert jnp.allclose(out_bf16, ref_bf16, atol=5e-2, rtol=5e-2), (
        "bf16 path max abs err = "
        + str(float(jnp.max(jnp.abs(out_bf16 - ref_bf16)))))

    print("KERNEL_OK")
</pallas_src>

<mosaic_0001>
module attributes {stable_mosaic.version = 11 : i64} {
  func.func @kernel(%arg0: i32, %arg1: i32, %arg2: i32, %arg3: memref<1x8x32xf32, #tpu.memory_space<vmem>>, %arg4: memref<1x32x8xf32, #tpu.memory_space<vmem>>, %arg5: memref<1x32x8xf32, #tpu.memory_space<vmem>>, %arg6: memref<1x32x8xf32, #tpu.memory_space<vmem>>, %arg7: memref<1x8x32xf32, #tpu.memory_space<vmem>>, %arg8: memref<1x32xf32, #tpu.memory_space<vmem>>, %arg9: memref<1x8x32xf32, #tpu.memory_space<vmem>>, %arg10: memref<8x8xf32, #tpu.memory_space<vmem>>, %arg11: memref<8x1xf32, #tpu.memory_space<vmem>>, %arg12: memref<8x1xf32, #tpu.memory_space<vmem>>, %arg13: memref<8x8xf32, #tpu.memory_space<vmem>>) attributes {dimension_semantics = [#tpu.dimension_semantics<parallel>, #tpu.dimension_semantics<arbitrary>, #tpu.dimension_semantics<arbitrary>], iteration_bounds = array<i64: 2, 4, 1>, scalar_prefetch = 0 : i64, scratch_operands = 4 : i64, tpu.core_type = #tpu.core_type<tc>, window_params = [{transform_indices = @transform_0, window_bounds = array<i64: 1, 8, 32>}, {transform_indices = @transform_1, window_bounds = array<i64: 1, 32, 8>}, {transform_indices = @transform_2, window_bounds = array<i64: 1, 32, 8>}, {transform_indices = @transform_3, window_bounds = array<i64: 1, 32, 8>}, {transform_indices = @transform_4, window_bounds = array<i64: 1, 8, 32>}, {pipeline_mode = #tpu.pipeline_mode<synchronous>, transform_indices = @transform_5, window_bounds = array<i64: 1, 32>}, {transform_indices = @transform_6, window_bounds = array<i64: 1, 8, 32>}]} {
    %c0_i32 = arith.constant 0 : i32
    %0 = arith.cmpi eq, %arg1, %c0_i32 : i32
    %c0_i32_0 = arith.constant 0 : i32
    %1 = arith.cmpi eq, %arg2, %c0_i32_0 : i32
    %2 = arith.andi %0, %1 : i1
    %3 = arith.extui %2 : i1 to i32
    %c0_i32_1 = arith.constant 0 : i32
    %4 = arith.cmpi ne, %3, %c0_i32_1 : i32
    scf.if %4 {
      %c0_34 = arith.constant 0 : index
      %c0_35 = arith.constant 0 : index
      %47 = vector.load %arg8[%c0_34, %c0_35] : memref<1x32xf32, #tpu.memory_space<vmem>>, vector<1x32xf32>
      %48 = vector.shape_cast %47 : vector<1x32xf32> to vector<1x32xf32>
      %49 = vector.broadcast %48 : vector<1x32xf32> to vector<8x32xf32>
      %c0_36 = arith.constant 0 : index
      %c0_37 = arith.constant 0 : index
      %c0_38 = arith.constant 0 : index
      %50 = vector.load %arg9[%c0_36, %c0_37, %c0_38] : memref<1x8x32xf32, #tpu.memory_space<vmem>>, vector<1x8x32xf32>
      %51 = vector.shape_cast %50 : vector<1x8x32xf32> to vector<8x32xf32>
      %52 = vector.shape_cast %49 : vector<8x32xf32> to vector<1x8x32xf32>
      tpu.vector_store %arg9[%c0_36, %c0_37, %c0_38], %52 {strides = array<i32>} : memref<1x8x32xf32, #tpu.memory_space<vmem>>, vector<1x8x32xf32>,
    } else {
    }
    %c0_i32_2 = arith.constant 0 : i32
    %5 = arith.cmpi eq, %arg2, %c0_i32_2 : i32
    %6 = arith.extui %5 : i1 to i32
    %c0_i32_3 = arith.constant 0 : i32
    %7 = arith.cmpi ne, %6, %c0_i32_3 : i32
    scf.if %7 {
      %c0_34 = arith.constant 0 : index
      %c0_35 = arith.constant 0 : index
      %c0_36 = arith.constant 0 : index
      %47 = vector.load %arg3[%c0_34, %c0_35, %c0_36] : memref<1x8x32xf32, #tpu.memory_space<vmem>>, vector<1x8x32xf32>
      %48 = vector.shape_cast %47 : vector<1x8x32xf32> to vector<8x32xf32>
      %c0_37 = arith.constant 0 : index
      %c0_38 = arith.constant 0 : index
      %c0_39 = arith.constant 0 : index
      %49 = vector.load %arg4[%c0_37, %c0_38, %c0_39] : memref<1x32x8xf32, #tpu.memory_space<vmem>>, vector<1x32x8xf32>
      %50 = vector.shape_cast %49 : vector<1x32x8xf32> to vector<32x8xf32>
      %cst_40 = arith.constant dense<0.000000e+00> : vector<8x8xf32>
      %51 = tpu.matmul %48, %50, %cst_40 {dimension_numbers = #tpu.dot_dimension_numbers<[1], [0], [0], [1], [0, 0, 1, 1], [], []>} : vector<8x32xf32>, vector<32x8xf32>, vector<8x8xf32> -> vector<8x8xf32>
      %c0_41 = arith.constant 0 : index
      %c0_42 = arith.constant 0 : index
      %52 = vector.load %arg10[%c0_41, %c0_42] : memref<8x8xf32, #tpu.memory_space<vmem>>, vector<8x8xf32>
      tpu.vector_store %arg10[%c0_41, %c0_42], %51 {strides = array<i32>} : memref<8x8xf32, #tpu.memory_space<vmem>>, vector<8x8xf32>,
      %cst_43 = arith.constant 0xFF800000 : f32
      %53 = vector.broadcast %cst_43 : f32 to vector<8x1xf32>
      %c0_44 = arith.constant 0 : index
      %c0_45 = arith.constant 0 : index
      %54 = vector.load %arg11[%c0_44, %c0_45] : memref<8x1xf32, #tpu.memory_space<vmem>>, vector<8x1xf32>
      tpu.vector_store %arg11[%c0_44, %c0_45], %53 {strides = array<i32>} : memref<8x1xf32, #tpu.memory_space<vmem>>, vector<8x1xf32>,
      %cst_46 = arith.constant 0.000000e+00 : f32
      %55 = vector.broadcast %cst_46 : f32 to vector<8x1xf32>
      %c0_47 = arith.constant 0 : index
      %c0_48 = arith.constant 0 : index
      %56 = vector.load %arg12[%c0_47, %c0_48] : memref<8x1xf32, #tpu.memory_space<vmem>>, vector<8x1xf32>
      tpu.vector_store %arg12[%c0_47, %c0_48], %55 {strides = array<i32>} : memref<8x1xf32, #tpu.memory_space<vmem>>, vector<8x1xf32>,
      %cst_49 = arith.constant 0.000000e+00 : f32
      %57 = vector.broadcast %cst_49 : f32 to vector<8x8xf32>
      %c0_50 = arith.constant 0 : index
      %c0_51 = arith.constant 0 : index
      %58 = vector.load %arg13[%c0_50, %c0_51] : memref<8x8xf32, #tpu.memory_space<vmem>>, vector<8x8xf32>
      tpu.vector_store %arg13[%c0_50, %c0_51], %57 {strides = array<i32>} : memref<8x8xf32, #tpu.memory_space<vmem>>, vector<8x8xf32>,
    } else {
    }
    %c8_i32 = arith.constant 8 : i32
    %8 = arith.muli %arg2, %c8_i32 : i32
    %9 = tpu.assume_multiple %8, 8 : i32
    %c0 = arith.constant 0 : index
    %10 = arith.index_cast %9 : i32 to index
    %c0_4 = arith.constant 0 : index
    %11 = vector.load %arg3[%c0, %10, %c0_4] : memref<1x8x32xf32, #tpu.memory_space<vmem>>, vector<1x8x32xf32>
    %12 = vector.shape_cast %11 : vector<1x8x32xf32> to vector<8x32xf32>
    %c0_5 = arith.constant 0 : index
    %c0_6 = arith.constant 0 : index
    %c0_7 = arith.constant 0 : index
    %13 = vector.load %arg5[%c0_5, %c0_6, %c0_7] : memref<1x32x8xf32, #tpu.memory_space<vmem>>, vector<1x32x8xf32>
    %14 = vector.shape_cast %13 : vector<1x32x8xf32> to vector<32x8xf32>
    %cst = arith.constant dense<0.000000e+00> : vector<8x8xf32>
    %15 = tpu.matmul %12, %14, %cst {dimension_numbers = #tpu.dot_dimension_numbers<[1], [0], [0], [1], [0, 0, 1, 1], [], []>} : vector<8x32xf32>, vector<32x8xf32>, vector<8x8xf32> -> vector<8x8xf32>
    %c0_8 = arith.constant 0 : index
    %c0_9 = arith.constant 0 : index
    %c0_10 = arith.constant 0 : index
    %16 = vector.load %arg6[%c0_8, %c0_9, %c0_10] : memref<1x32x8xf32, #tpu.memory_space<vmem>>, vector<1x32x8xf32>
    %17 = vector.shape_cast %16 : vector<1x32x8xf32> to vector<32x8xf32>
    %cst_11 = arith.constant dense<0.000000e+00> : vector<8x8xf32>
    %18 = tpu.matmul %12, %17, %cst_11 {dimension_numbers = #tpu.dot_dimension_numbers<[1], [0], [0], [1], [0, 0, 1, 1], [], []>} : vector<8x32xf32>, vector<32x8xf32>, vector<8x8xf32> -> vector<8x8xf32>
    %c0_12 = arith.constant 0 : index
    %c0_13 = arith.constant 0 : index
    %19 = vector.load %arg10[%c0_12, %c0_13] : memref<8x8xf32, #tpu.memory_space<vmem>>, vector<8x8xf32>
    %cst_14 = arith.constant dense<0.000000e+00> : vector<8x8xf32>
    %20 = tpu.matmul %19, %15, %cst_14 {dimension_numbers = #tpu.dot_dimension_numbers<[1], [1], [0], [0], [0, 0, 1, 0], [], []>} : vector<8x8xf32>, vector<8x8xf32>, vector<8x8xf32> -> vector<8x8xf32>
    %c0_15 = arith.constant 0 : index
    %c0_16 = arith.constant 0 : index
    %21 = vector.load %arg11[%c0_15, %c0_16] : memref<8x1xf32, #tpu.memory_space<vmem>>, vector<8x1xf32>
    %cst_17 = arith.constant dense<0xFF800000> : vector<8xf32>
    %22 = vector.multi_reduction <maximumf>, %20, %cst_17 [1] : vector<8x8xf32> to vector<8xf32>
    %23 = vector.shape_cast %22 : vector<8xf32> to vector<8x1xf32>
    %24 = arith.maximumf %21, %23 : vector<8x1xf32>
    %c0_18 = arith.constant 0 : index
    %c0_19 = arith.constant 0 : index
    %25 = vector.load %arg11[%c0_18, %c0_19] : memref<8x1xf32, #tpu.memory_space<vmem>>, vector<8x1xf32>
    %26 = arith.subf %25, %24 : vector<8x1xf32>
    %27 = math.exp %26 : vector<8x1xf32>
    %28 = vector.broadcast %24 : vector<8x1xf32> to vector<8x8xf32>
    %29 = arith.subf %20, %28 : vector<8x8xf32>
    %30 = math.exp %29 : vector<8x8xf32>
    %c0_20 = arith.constant 0 : index
    %c0_21 = arith.constant 0 : index
    %31 = vector.load %arg12[%c0_20, %c0_21] : memref<8x1xf32, #tpu.memory_space<vmem>>, vector<8x1xf32>
    %32 = arith.mulf %27, %31 : vector<8x1xf32>
    %cst_22 = arith.constant dense<0.000000e+00> : vector<8xf32>
    %33 = vector.multi_reduction <add>, %30, %cst_22 [1] : vector<8x8xf32> to vector<8xf32>
    %34 = vector.shape_cast %33 : vector<8xf32> to vector<8x1xf32>
    %35 = arith.addf %32, %34 : vector<8x1xf32>
    %c0_23 = arith.constant 0 : index
    %c0_24 = arith.constant 0 : index
    %36 = vector.load %arg12[%c0_23, %c0_24] : memref<8x1xf32, #tpu.memory_space<vmem>>, vector<8x1xf32>
    tpu.vector_store %arg12[%c0_23, %c0_24], %35 {strides = array<i32>} : memref<8x1xf32, #tpu.memory_space<vmem>>, vector<8x1xf32>,
    %c0_25 = arith.constant 0 : index
    %c0_26 = arith.constant 0 : index
    %37 = vector.load %arg13[%c0_25, %c0_26] : memref<8x8xf32, #tpu.memory_space<vmem>>, vector<8x8xf32>
    %38 = vector.broadcast %27 : vector<8x1xf32> to vector<8x8xf32>
    %39 = arith.mulf %38, %37 : vector<8x8xf32>
    %cst_27 = arith.constant dense<0.000000e+00> : vector<8x8xf32>
    %40 = tpu.matmul %30, %18, %cst_27 {dimension_numbers = #tpu.dot_dimension_numbers<[1], [0], [0], [1], [0, 0, 1, 1], [], []>} : vector<8x8xf32>, vector<8x8xf32>, vector<8x8xf32> -> vector<8x8xf32>
    %41 = arith.addf %39, %40 : vector<8x8xf32>
    %c0_28 = arith.constant 0 : index
    %c0_29 = arith.constant 0 : index
    %42 = vector.load %arg13[%c0_28, %c0_29] : memref<8x8xf32, #tpu.memory_space<vmem>>, vector<8x8xf32>
    tpu.vector_store %arg13[%c0_28, %c0_29], %41 {strides = array<i32>} : memref<8x8xf32, #tpu.memory_space<vmem>>, vector<8x8xf32>,
    %c0_30 = arith.constant 0 : index
    %c0_31 = arith.constant 0 : index
    %43 = vector.load %arg11[%c0_30, %c0_31] : memref<8x1xf32, #tpu.memory_space<vmem>>, vector<8x1xf32>
    tpu.vector_store %arg11[%c0_30, %c0_31], %24 {strides = array<i32>} : memref<8x1xf32, #tpu.memory_space<vmem>>, vector<8x1xf32>,
    %c0_i32_32 = arith.constant 0 : i32
    %44 = arith.cmpi eq, %arg2, %c0_i32_32 : i32
    %45 = arith.extui %44 : i1 to i32
    %c0_i32_33 = arith.constant 0 : i32
    %46 = arith.cmpi ne, %45, %c0_i32_33 : i32
    scf.if %46 {
      %c0_34 = arith.constant 0 : index
      %c0_35 = arith.constant 0 : index
      %47 = vector.load %arg13[%c0_34, %c0_35] : memref<8x8xf32, #tpu.memory_space<vmem>>, vector<8x8xf32>
      %c0_36 = arith.constant 0 : index
      %c0_37 = arith.constant 0 : index
      %48 = vector.load %arg12[%c0_36, %c0_37] : memref<8x1xf32, #tpu.memory_space<vmem>>, vector<8x1xf32>
      %49 = tpu.reciprocal %48 : vector<8x1xf32> -> vector<8x1xf32>
      %50 = vector.broadcast %49 : vector<8x1xf32> to vector<8x8xf32>
      %51 = arith.mulf %47, %50 : vector<8x8xf32>
      %c0_38 = arith.constant 0 : index
      %c0_39 = arith.constant 0 : index
      %c0_40 = arith.constant 0 : index
      %52 = vector.load %arg7[%c0_38, %c0_39, %c0_40] : memref<1x8x32xf32, #tpu.memory_space<vmem>>, vector<1x8x32xf32>
      %53 = vector.shape_cast %52 : vector<1x8x32xf32> to vector<8x32xf32>
      %cst_41 = arith.constant dense<0.000000e+00> : vector<8x32xf32>
      %54 = tpu.matmul %51, %53, %cst_41 {dimension_numbers = #tpu.dot_dimension_numbers<[1], [0], [0], [1], [0, 0, 1, 1], [], []>} : vector<8x8xf32>, vector<8x32xf32>, vector<8x32xf32> -> vector<8x32xf32>
      %c0_42 = arith.constant 0 : index
      %c0_43 = arith.constant 0 : index
      %c0_44 = arith.constant 0 : index
      %55 = vector.load %arg9[%c0_42, %c0_43, %c0_44] : memref<1x8x32xf32, #tpu.memory_space<vmem>>, vector<1x8x32xf32>
      %56 = vector.shape_cast %55 : vector<1x8x32xf32> to vector<8x32xf32>
      %57 = arith.addf %56, %54 : vector<8x32xf32>
      %c0_45 = arith.constant 0 : index
      %c0_46 = arith.constant 0 : index
      %c0_47 = arith.constant 0 : index
      %58 = vector.load %arg9[%c0_45, %c0_46, %c0_47] : memref<1x8x32xf32, #tpu.memory_space<vmem>>, vector<1x8x32xf32>
      %59 = vector.shape_cast %58 : vector<1x8x32xf32> to vector<8x32xf32>
      %60 = vector.shape_cast %57 : vector<8x32xf32> to vector<1x8x32xf32>
      tpu.vector_store %arg9[%c0_45, %c0_46, %c0_47], %60 {strides = array<i32>} : memref<1x8x32xf32, #tpu.memory_space<vmem>>, vector<1x8x32xf32>,
    } else {
    }
    return
  }
  func.func @transform_0(%arg0: i32, %arg1: i32, %arg2: i32) -> (i32, i32, i32) {
    %c0_i32 = arith.constant 0 : i32
    %c0_i32_0 = arith.constant 0 : i32
    %c0_i32_1 = arith.constant 0 : i32
    return %arg0, %c0_i32, %c0_i32_0 : i32, i32, i32
  }
  func.func @transform_1(%arg0: i32, %arg1: i32, %arg2: i32) -> (i32, i32, i32) {
    %c0_i32 = arith.constant 0 : i32
    %c0_i32_0 = arith.constant 0 : i32
    %c0_i32_1 = arith.constant 0 : i32
    return %arg1, %c0_i32, %c0_i32_0 : i32, i32, i32
  }
  func.func @transform_2(%arg0: i32, %arg1: i32, %arg2: i32) -> (i32, i32, i32) {
    %c0_i32 = arith.constant 0 : i32
    %c0_i32_0 = arith.constant 0 : i32
    %c0_i32_1 = arith.constant 0 : i32
    return %arg1, %c0_i32, %c0_i32_0 : i32, i32, i32
  }
  func.func @transform_3(%arg0: i32, %arg1: i32, %arg2: i32) -> (i32, i32, i32) {
    %c0_i32 = arith.constant 0 : i32
    %c0_i32_0 = arith.constant 0 : i32
    %c0_i32_1 = arith.constant 0 : i32
    return %arg1, %c0_i32, %c0_i32_0 : i32, i32, i32
  }
  func.func @transform_4(%arg0: i32, %arg1: i32, %arg2: i32) -> (i32, i32, i32) {
    %c0_i32 = arith.constant 0 : i32
    %c0_i32_0 = arith.constant 0 : i32
    %c0_i32_1 = arith.constant 0 : i32
    return %arg1, %c0_i32, %c0_i32_0 : i32, i32, i32
  }
  func.func @transform_5(%arg0: i32, %arg1: i32, %arg2: i32) -> (i32, i32) {
    %c0_i32 = arith.constant 0 : i32
    %c0_i32_0 = arith.constant 0 : i32
    %c0_i32_1 = arith.constant 0 : i32
    return %c0_i32, %c0_i32_0 : i32, i32
  }
  func.func @transform_6(%arg0: i32, %arg1: i32, %arg2: i32) -> (i32, i32, i32) {
    %c0_i32 = arith.constant 0 : i32
    %c0_i32_0 = arith.constant 0 : i32
    %c0_i32_1 = arith.constant 0 : i32
    return %arg0, %c0_i32, %c0_i32_0 : i32, i32, i32
  }
}

</mosaic_0001>

<bundles_post_ra>
// kernel: tpu_custom_call.1
= control target key start
LH: loop header
LB: loop body
LE: loop exit
PB: predicated region body
PF: predicated region fallthrough
CT: control target
= control target key end

     0   :  { %s2318_s0 = inlined_call_operand.hbm [shape: f32[2,8,32], index: 0, kind: input, shape index: {}]   ;;  %s2319_s1 = inlined_call_operand.hbm [shape: f32[4,32,8], index: 1, kind: input, shape index: {}]   ;;  %s2320_s2 = inlined_call_operand.hbm [shape: f32[4,32,8], index: 2, kind: input, shape index: {}]   ;;  %s2321_s3 = inlined_call_operand.hbm [shape: f32[4,32,8], index: 3, kind: input, shape index: {}]   ;;  %s2322_s4 = inlined_call_operand.hbm [shape: f32[4,8,32], index: 4, kind: input, shape index: {}]   ;;  %s2323_s5 = inlined_call_operand.hbm [shape: f32[1,32], index: 5, kind: input, shape index: {}]   ;;  %s2324_s6 = inlined_call_operand.hbm [shape: f32[2,8,32], index: 6, kind: output, shape index: {}]  }
   0x1   :  { %2355 = sst [smem:[#allocation36_spill]] %s2319_s1 }
   0x2   :  { %2356 = sst [smem:[#allocation37_spill]] %s2321_s3 }
   0x3   :  { %2357 = sst [smem:[#allocation38_spill]] %s2323_s5 }
   0x4   :  { %2358 = sst [smem:[#allocation39_spill]] %s2324_s6 }
   0x5   :  { %11 = vsyncpa [#allocation7], 0 }
   0x6   :  { %13 = vsyncpa [#allocation7 + $0x1], 0 }
   0x7   :  { %14 = vsyncpa [#allocation10], 0 }
   0x8   :  { %16 = vsyncpa [#allocation10 + $0x1], 0 }
   0x9   :  { %17 = vsyncpa [#allocation13], 0 }
   0xa   :  { %19 = vsyncpa [#allocation13 + $0x1], 0 }
   0xb   :  { %20 = vsyncpa [#allocation16], 0 }
   0xc   :  { %21 = vsyncpa [#allocation8], 0 }
   0xd   :  { %23 = vsyncpa [#allocation8 + $0x1], 0  ;;  %s1819_s21 = smov 0   ;;  %s1821_s22 = smov 0  }
   0xe   :  { %s1823_s23 = smov 0   ;;  %s1825_s24 = smov 0  }
   0xf   :  { %s1827_s25 = smov 0   ;;  %s1829_s26 = smov 0  }
  0x10   :  { %s1831_s27 = smov 0   ;;  %s1833_s28 = smov 0  }
  0x11   :  { %s1835_s29 = smov 0   ;;  %s1837_s30 = smov 0  }
  0x12   :  { %s1839_s7 = smov 0  }
  0x13 LB: > { %2359 = sst [smem:[#allocation23_spill]] %s1732_s22  ;;  %p2329_p0 = scmp.eq.s32.totalorder %s1768_s7, 0  ;;  %s1768_s7 = sphi %s1839_s7, %s29_s7   ;;  %s1764_s30 = sphi %s1837_s30, %s2427_s30   ;;  %s1760_s29 = sphi %s1835_s29, %s2426_s29   ;;  %s1756_s28 = sphi %s1833_s28, %s2417_s28   ;;  %s1752_s27 = sphi %s1831_s27, %s2425_s27   ;;  %s1748_s26 = sphi %s1829_s26, %s2424_s26   ;;  %s1744_s25 = sphi %s1827_s25, %s2423_s25   ;;  %s1740_s24 = sphi %s1825_s24, %s2422_s24   ;;  %s1736_s23 = sphi %s1823_s23, %s2421_s23   ;;  %s1732_s22 = sphi %s1821_s22, %s2420_s22   ;;  %s1728_s21 = sphi %s1819_s21, %s2415_s21  }
  0x14   : > { %2360 = sst [smem:[#allocation24_spill]] %s1740_s24  ;;  %p88_p1 = scmp.ne.s32.totalorder %s1736_s23, %s1732_s22 }
  0x15   : > { %2361 = sst [smem:[#allocation25_spill]] %s1752_s27  ;;  %p2328_p2 = scmp.lt.s32.totalorder %s1768_s7, 8 }
  0x16   : > { %2362 = sst [smem:[#allocation26_spill]] %s1756_s28  ;;  %s2327_s9 = sand.u32 1, %s1768_s7  }
  0x17   : > { %2363 = sst [smem:[#allocation27_spill]] %s1764_s30  ;;  %p90_p3 = por %p88_p1, %p2329_p0 }
  0x18   : > { %s2325_s10 = sand.u32 1, %s1736_s23   ;;  %s1884_s11 = sshll.u32 %s1760_s29, 9 }
  0x19   : > { %s1888_s12 = sshll.u32 %s2325_s10, 5  ;;  %s2364_s1 = sld [smem:[#allocation36_spill]] }
  0x1a   : > { %p1898_p4 = pnand %p2328_p2, %p90_p3  ;;  %s276_s17 = scalar_lea.vmem [#allocation9], %s1888_s12 }
  0x1b   : > { %s283_s18 = sshll.u32 %s276_s17, 4  ;;  %s1907_s19 = scalar_lea.sflag [#allocation10], %s2327_s9  ;;  %s1903_s18 = int_to_ptr.vmem [resolvable:$true] %s283_s18 }
  0x1c   : > { %s2365_s16 = scalar_select %p1898_p4, 1, 0 }
  0x1d   : > { %p1913_p6 = pneg %p1898_p4 }
  0x1f   : > { %s1894_s15 = scalar_lea.hbm %s2364_s1, %s1884_s11  ;;  %s1461_s17 = scalar_lea.hbm %s2364_s1, 2048 }
  0x20   : > { %s1456_s20 = scalar_lea.hbm %s1894_s15, 512  ;;  %p1462_p9 = scmp.lt.u32.totalorder %s1894_s15, %s2364_s1 }
  0x21   : > { %p1457_p5 = scmp.ne.s32.totalorder %s1894_s15, %s1456_s20  ;;  %p1463_p10 = scmp.lt.u32.totalorder %s1461_s17, %s1456_s20 }
  0x22   : > { %s2366_s13 = scalar_select %p1913_p6, 1, 0 }
  0x23   : > { %p1459_p7 = pnand %p1913_p6, %p1457_p5  ;;  %p1464_p11 = por %p1463_p10, %p1462_p9 }
  0x24   : > { %p1465_p12 = scmp.lt.u32.totalorder %s1456_s20, %s1894_s15 }
  0x25   : > { %p1460_p8 = pneg %p1459_p7 }
  0x26   : > { %p1466_p13 = por %p1465_p12, %p1464_p11 }
  0x28   : > { %p1467_p1 = pnand %p1466_p13, %p1460_p8 }
  0x2a   : > { %1470 = shalt.err (!%p1467_p1)
}
  0x2b   : > { %s1471_s9 = scalar_lea.vmem %s1903_s18, 512  ;;  %s1770_s10 = smov [#allocation9]  }
  0x2c   : > { %p1472_p3 = scmp.ne.s32.totalorder %s1903_s18, %s1471_s9  ;;  %s1476_s14 = sshll.u32 %s1770_s10, 4  ;;  %s1477_s14 = int_to_ptr.vmem [resolvable:$false] %s1476_s14 }
  0x2d   : > { %s1478_s6 = scalar_lea.vmem %s1477_s14, 1024  ;;  %p1479_p2 = scmp.lt.s32.totalorder %s1903_s18, %s1477_s14 }
  0x2e   : > { %p1474_p5 = pnand %p1472_p3, %p1913_p6  ;;  %p1480_p0 = scmp.lt.s32.totalorder %s1478_s6, %s1471_s9 }
  0x30   : > { %p1475_p7 = pneg %p1474_p5  ;;  %p1481_p9 = por %p1480_p0, %p1479_p2 }
  0x32   : > { %p1482_p10 = pnand %p1481_p9, %p1475_p7 }
  0x34   : > { %1485 = shalt.err (!%p1482_p10)
}
  0x35   : > { %s2330_s8 = smov 128   ;;  %s2332_s20 = smov 8  }
  0x36   : > { %1334 = dma.hbm_to_vmem [thread:$0]  (!%p1898_p4), %s1894_s15, 512, %s1903_s18, %s1907_s19, %s2330_s8, %s2330_s8, %s2332_s20  }
  0x37   : > { %s2367_s3 = sld [smem:[#allocation37_spill]]  ;;  %s318_s14 = scalar_lea.vmem [#allocation12], %s1888_s12 }
  0x38   : > { %s325_s6 = sshll.u32 %s318_s14, 4  ;;  %s2368_s1 = sand.u32 1, %s1768_s7   ;;  %s1947_s6 = int_to_ptr.vmem [resolvable:$true] %s325_s6 }
  0x39   : > { %s1951_s28 = scalar_lea.sflag [#allocation13], %s2368_s1 }
  0x3a   : > { %2369 = sst [smem:[#allocation28_spill]] %s1951_s28 }
  0x3d   : > { %s1944_s10 = scalar_lea.hbm %s2367_s3, %s1884_s11  ;;  %s1491_s17 = scalar_lea.hbm %s2367_s3, 2048 }
  0x3e   : > { %s1486_s27 = scalar_lea.hbm %s1944_s10, 512  ;;  %p1492_p11 = scmp.lt.u32.totalorder %s1944_s10, %s2367_s3 }
  0x3f   : > { %p1487_p0 = scmp.ne.s32.totalorder %s1944_s10, %s1486_s27  ;;  %p1493_p12 = scmp.lt.u32.totalorder %s1491_s17, %s1486_s27 }
  0x40   : > { %p1495_p1 = scmp.lt.u32.totalorder %s1486_s27, %s1944_s10 }
  0x41   : > { %p1489_p2 = pnand %p1487_p0, %p1913_p6  ;;  %p1494_p13 = por %p1493_p12, %p1492_p11 }
  0x43   : > { %p1490_p8 = pneg %p1489_p2  ;;  %p1496_p3 = por %p1495_p1, %p1494_p13 }
  0x45   : > { %p1497_p5 = pnand %p1496_p3, %p1490_p8 }
  0x47   : > { %1500 = shalt.err (!%p1497_p5)
}
  0x48   : > { %s1501_s1 = scalar_lea.vmem %s1947_s6, 512  ;;  %s1773_s14 = smov [#allocation12]  }
  0x49   : > { %p1502_p7 = scmp.ne.s32.totalorder %s1947_s6, %s1501_s1  ;;  %s1506_s15 = sshll.u32 %s1773_s14, 4  ;;  %s1507_s15 = int_to_ptr.vmem [resolvable:$false] %s1506_s15 }
  0x4a   : > { %s1508_s8 = scalar_lea.vmem %s1507_s15, 1024  ;;  %p1509_p0 = scmp.lt.s32.totalorder %s1947_s6, %s1507_s15 }
  0x4b   : > { %p1504_p9 = pnand %p1502_p7, %p1913_p6  ;;  %p1510_p2 = scmp.lt.s32.totalorder %s1508_s8, %s1501_s1 }
  0x4d   : > { %p1505_p10 = pneg %p1504_p9  ;;  %p1511_p11 = por %p1510_p2, %p1509_p0 }
  0x4f   : > { %p1512_p12 = pnand %p1511_p11, %p1505_p10 }
  0x51   : > { %1515 = shalt.err (!%p1512_p12)
}
  0x52   : > { %s2370_s27 = smov 128   ;;  %s1979_s18 = sadd.s32 4294967295, %s1768_s7  }
  0x53   : > { %1340 = dma.hbm_to_vmem [thread:$0]  (!%p1898_p4), %s1944_s10, 512, %s1947_s6, %s1951_s28, %s2370_s27, %s2370_s27, %s2332_s20  }
  0x54   : > { %s1179_s17 = sadd.s32 4294967294, %s1768_s7   ;;  %p68_p8 = scmp.ne.s32.totalorder %s1744_s25, %s1740_s24 }
  0x55   : > { %p2341_p13 = scmp.eq.s32.totalorder %s1979_s18, 0  ;;  %p94_p1 = scmp.ne.s32.totalorder %s1732_s22, %s1728_s21 }
  0x56   : > { %p223_p7 = scmp.eq.s32.totalorder %s1179_s17, 7  ;;  %p1180_p10 = scmp.ge.s32.totalorder %s1768_s7, 1 }
  0x57   : > { %p1990_p5 = por %p2341_p13, %p68_p8  ;;  %p1996_p9 = por %p94_p1, %p2341_p13 }
  0x58   : > { %p2001_p0 = por %p223_p7, %p68_p8  ;;  %p230_p2 = scmp.lt.s32.totalorder %s1768_s7, 9 }
  0x59   : > { %s2371_s9 = scalar_select %p1990_p5, 1, 0 }
  0x5a   : > { %s2373_s10 = scalar_select %p1996_p9, 1, 0 }
  0x5b   : > { %2372 = sst [smem:[#allocation29_spill]] %s2371_s9  ;;  %p2006_p11 = pnand %p1180_p10, %p230_p2 }
  0x5c   : > { %2374 = sst [smem:[#allocation30_spill]] %s2373_s10  ;;  %s1774_s1 = smov [#allocation15]  }
  0x5d   : > { %s2375_s6 = scalar_select %p2001_p0, 1, 0 }
  0x5e   : > { %s2377_s21 = scalar_select %p2006_p11, 1, 0 }
  0x5f   : > { %2376 = sst [smem:[#allocation31_spill]] %s2375_s6  ;;  %s243_s14 = sshll.u32 %s1774_s1, 4  ;;  %s244_s14 = int_to_ptr.vmem [resolvable:$true] %s243_s14 }
  0x60   : > { %2378 = sst [smem:[#allocation32_spill]] %s2377_s21  ;;  %p1324_p12 = pneg %p2006_p11 }
  0x61   : > { %s44_s8 = sadd.s32 1, %s1760_s29  ;;  %s48_s20 = sadd.s32 1, %s1764_s30 }
  0x62   : > { %p2014_p1 = pnand %p1324_p12, %p2341_p13  ;;  %p2019_p8 = scmp.ge.s32.totalorder %s44_s8, 4 }
  0x63   : > { %s55_s3 = sadd.s32 1, %s1748_s26  ;;  %s2381_s5 = sld [smem:[#allocation38_spill]] }
  0x64   : > { %s2380_s17 = scalar_select %p2019_p8, 1, 0 }
  0x65   : > { %p1518_p10 = pneg %p2014_p1 }
  0x69   : > { %s1516_s1 = scalar_lea.hbm %s2381_s5, 16 }
  0x6a   : > { %p1517_p7 = scmp.ne.s32.totalorder %s2381_s5, %s1516_s1  ;;  %p1523_p13 = scmp.lt.u32.totalorder %s1516_s1, %s2381_s5 }
  0x6c   : > { %p1519_p2 = pnand %p1518_p10, %p1517_p7 }
  0x6e   : > { %p1520_p12 = pneg %p1519_p2 }
  0x70   : > { %p1525_p3 = pnand %p1523_p13, %p1520_p12 }
  0x72   : > { %1528 = shalt.err (!%p1525_p3)
}
  0x73   : > { %s1529_s28 = scalar_lea.vmem %s244_s14, 16  ;;  %s1536_s24 = scalar_lea.vmem %s244_s14, 32 }
  0x74   : > { %p1530_p0 = scmp.ne.s32.totalorder %s244_s14, %s1529_s28  ;;  %p1537_p11 = scmp.lt.s32.totalorder %s244_s14, %s244_s14 }
  0x75   : > { %p1538_p4 = scmp.lt.s32.totalorder %s1536_s24, %s1529_s28 }
  0x76   : > { %p1532_p9 = pnand %p1530_p0, %p1518_p10 }
  0x77   : > { %p1539_p6 = por %p1538_p4, %p1537_p11 }
  0x78   : > { %p1533_p5 = pneg %p1532_p9 }
  0x7a   : > { %p1540_p8 = pnand %p1539_p6, %p1533_p5 }
  0x7c   : > { %1543 = shalt.err (!%p1540_p8)
}
  0x7d   : > { %1327 = dma.hbm_to_vmem [thread:$0]  (!%p2014_p1), %s2381_s5, 16, %s244_s14, [#allocation16]  }
  0x7e   : > { %p2382_p4 = scmp.ne.s32.totalorder %s2380_s17, 0  ;;  %p62_p6 = scmp.ne.s32.totalorder %s1748_s26, %s1744_s25 }
  0x7f   : > { %p2384_p5 = scmp.eq.s32.totalorder %s1768_s7, 0  ;;  %p2386_p0 = scmp.eq.s32.totalorder %s1979_s18, 7 }
  0x80   : > { %s2429_s8 = smov (%p2382_p4, %s44_s8), 0  ;;  %s2431_s20 = smov (!%p2382_p4, %s48_s20), %s1764_s30 }
  0x81   : > { %2383 = sst [smem:[#allocation33_spill]] %s2429_s8  ;;  %s78_s28 = ssub.s32 %s1760_s29, %s2429_s8 }
  0x82   : > { %p50_p13 = scmp.ge.s32.totalorder %s2431_s20, 2  ;;  %p79_p3 = scmp.eq.s32.totalorder %s78_s28, 0 }
  0x83   : > { %p2054_p9 = por %p2384_p5, %p62_p6  ;;  %p2060_p11 = por %p2386_p0, %p62_p6 }
  0x84   : > { %s2433_s20 = smov (%p50_p13, %s2431_s20), 0  ;;  %s2389_s21 = sadd.s32 1, %s1736_s23 }
  0x85   : > { %s2387_s6 = scalar_select %p2060_p11, 1, 0 }
  0x86   : > { %2388 = sst [smem:[#allocation34_spill]] %s2433_s20  ;;  %s52_s15 = ssub.s32 %s1764_s30, %s2433_s20 }
  0x87   : > { %s2069_s14 = scalar_select %p79_p3, %s1736_s23, %s2389_s21  }
  0x88   : > { %s254_s17 = sand.u32 1, %s1748_s26   ;;  %p53_p1 = scmp.eq.s32.totalorder %s52_s15, 0 }
  0x89   : > { %s1183_s1 = sshll.u32 %s254_s17, 3  ;;  %s1184_s24 = sshll.u32 %s1764_s30, 7 }
  0x8a   : > { %s2078_s22 = scalar_select %p53_p1, %s1748_s26, %s55_s3  }
  0x8b   : > { %s2083_s5 = scalar_lea.hbm %s2318_s0, %s1184_s24  ;;  %s258_s8 = scalar_lea.vmem [#allocation6], %s1183_s1 }
  0x8c   : > { %2390 = sst [smem:[#allocation35_spill]] %s2078_s22  ;;  %s265_s21 = sshll.u32 %s258_s8, 4  ;;  %s2093_s21 = int_to_ptr.vmem [resolvable:$true] %s265_s21 }
  0x8d   : > { %p2391_p8 = scmp.lt.s32.totalorder %s1768_s7, 8  ;;  %s2099_s24 = scalar_lea.hbm %s2320_s2, %s1884_s11 }
  0x8e   : > { %s255_s28 = scalar_lea.sflag [#allocation7], %s254_s17  ;;  %s1544_s20 = scalar_lea.hbm %s2083_s5, 128 }
  0x8f   : > { %p2089_p7 = pnand %p2391_p8, %p2054_p9  ;;  %p1545_p10 = scmp.ne.s32.totalorder %s2083_s5, %s1544_s20 }
  0x90   : > { %s1549_s1 = scalar_lea.hbm %s2318_s0, 256  ;;  %p1550_p6 = scmp.lt.u32.totalorder %s2083_s5, %s2318_s0 }
  0x91   : > { %p1546_p2 = pneg %p2089_p7  ;;  %p1551_p13 = scmp.lt.u32.totalorder %s1549_s1, %s1544_s20 }
  0x92   : > { %p1553_p5 = scmp.lt.u32.totalorder %s1544_s20, %s2083_s5 }
  0x93   : > { %p1547_p12 = pnand %p1546_p2, %p1545_p10  ;;  %p1552_p3 = por %p1551_p13, %p1550_p6 }
  0x95   : > { %p1548_p4 = pneg %p1547_p12  ;;  %p1554_p9 = por %p1553_p5, %p1552_p3 }
  0x97   : > { %p1555_p0 = pnand %p1554_p9, %p1548_p4 }
  0x99   : > { %1558 = shalt.err (!%p1555_p0)
}
  0x9a   : > { %s1559_s11 = scalar_lea.vmem %s2093_s21, 128  ;;  %s1775_s17 = smov [#allocation6]  }
  0x9b   : > { %p1560_p1 = scmp.ne.s32.totalorder %s2093_s21, %s1559_s11  ;;  %s1564_s3 = sshll.u32 %s1775_s17, 4  ;;  %s1565_s3 = int_to_ptr.vmem [resolvable:$false] %s1564_s3 }
  0x9c   : > { %s1566_s30 = scalar_lea.vmem %s1565_s3, 256  ;;  %p1567_p12 = scmp.lt.s32.totalorder %s2093_s21, %s1565_s3 }
  0x9d   : > { %p1562_p8 = pnand %p1560_p1, %p1546_p2  ;;  %p1568_p6 = scmp.lt.s32.totalorder %s1566_s30, %s1559_s11 }
  0x9f   : > { %p1563_p10 = pneg %p1562_p8  ;;  %p1569_p13 = por %p1568_p6, %p1567_p12 }
  0xa1   : > { %p1570_p3 = pnand %p1569_p13, %p1563_p10 }
  0xa3   : > { %1573 = shalt.err (!%p1570_p3)
}
  0xa4   : > { %1331 = dma.hbm_to_vmem [thread:$0]  (!%p2089_p7), %s2083_s5, 128, %s2093_s21, %s255_s28  }
  0xa5   : > { %s297_s20 = scalar_lea.vmem [#allocation11], %s1888_s12  ;;  %s2393_s10 = sand.u32 1, %s1736_s23  }
  0xa6   : > { %s304_s22 = sshll.u32 %s297_s20, 4  ;;  %s2129_s8 = sshll.u32 %s2393_s10, 3  ;;  %s2131_s22 = int_to_ptr.vmem [resolvable:$true] %s304_s22 }
  0xa7   : > { %s1574_s9 = scalar_lea.hbm %s2099_s24, 512  ;;  %p2394_p4 = scmp.ne.s32.totalorder %s2366_s13, 0 }
  0xa8   : > { %p1575_p2 = scmp.ne.s32.totalorder %s2099_s24, %s1574_s9  ;;  %s1579_s11 = scalar_lea.hbm %s2320_s2, 2048 }
  0xa9   : > { %p1580_p7 = scmp.lt.u32.totalorder %s2099_s24, %s2320_s2  ;;  %p1581_p0 = scmp.lt.u32.totalorder %s1579_s11, %s1574_s9 }
  0xaa   : > { %p1577_p5 = pnand %p1575_p2, %p2394_p4  ;;  %p1583_p8 = scmp.lt.u32.totalorder %s1574_s9, %s2099_s24 }
  0xab   : > { %p1582_p1 = por %p1581_p0, %p1580_p7 }
  0xac   : > { %p1578_p9 = pneg %p1577_p5 }
  0xad   : > { %p1584_p10 = por %p1583_p8, %p1582_p1 }
  0xaf   : > { %p1585_p12 = pnand %p1584_p10, %p1578_p9 }
  0xb1   : > { %1588 = shalt.err (!%p1585_p12)
}
  0xb2   : > { %s1589_s5 = scalar_lea.vmem %s2131_s22, 512  ;;  %s1776_s12 = smov [#allocation11]  }
  0xb3   : > { %p1590_p6 = scmp.ne.s32.totalorder %s2131_s22, %s1589_s5  ;;  %s1594_s21 = sshll.u32 %s1776_s12, 4  ;;  %s1595_s21 = int_to_ptr.vmem [resolvable:$false] %s1594_s21 }
  0xb4   : > { %s1596_s28 = scalar_lea.vmem %s1595_s21, 1024  ;;  %p1597_p2 = scmp.lt.s32.totalorder %s2131_s22, %s1595_s21 }
  0xb5   : > { %p1592_p13 = pnand %p1590_p6, %p2394_p4  ;;  %p1598_p5 = scmp.lt.s32.totalorder %s1596_s28, %s1589_s5 }
  0xb7   : > { %p1593_p3 = pneg %p1592_p13  ;;  %p1599_p7 = por %p1598_p5, %p1597_p2 }
  0xb9   : > { %p1600_p0 = pnand %p1599_p7, %p1593_p3 }
  0xbb   : > { %1603 = shalt.err (!%p1600_p0)
}
  0xbc   : > { %p2395_p9 = scmp.ne.s32.totalorder %s2365_s16, 0  ;;  %s2396_s30 = smov 8  }
  0xbd   : > { %s1195_s20 = sshll.u32 %s1760_s29, 7  ;;  %s339_s10 = scalar_lea.vmem [#allocation14], %s2129_s8 }
  0xbe   : > { %1337 = dma.hbm_to_vmem [thread:$0]  (!%p2395_p9), %s2099_s24, 512, %s2131_s22, %s1907_s19, %s2370_s27, %s2370_s27, %s2396_s30  }
  0xbf   : > { %s346_s9 = sshll.u32 %s339_s10, 4  ;;  %s344_s11 = scalar_lea.hbm %s2322_s4, %s1195_s20  ;;  %s347_s9 = int_to_ptr.vmem [resolvable:$true] %s346_s9 }
  0xc0   : > { %s1604_s17 = scalar_lea.hbm %s344_s11, 128  ;;  %s1609_s12 = scalar_lea.hbm %s2322_s4, 512 }
  0xc1   : > { %p1605_p1 = scmp.ne.s32.totalorder %s344_s11, %s1604_s17  ;;  %p1610_p12 = scmp.lt.u32.totalorder %s344_s11, %s2322_s4 }
  0xc2   : > { %p1611_p6 = scmp.lt.u32.totalorder %s1609_s12, %s1604_s17  ;;  %p1613_p3 = scmp.lt.u32.totalorder %s1604_s17, %s344_s11 }
  0xc3   : > { %p1607_p8 = pnand %p1605_p1, %p2394_p4 }
  0xc4   : > { %p1612_p13 = por %p1611_p6, %p1610_p12 }
  0xc5   : > { %p1608_p10 = pneg %p1607_p8 }
  0xc6   : > { %p1614_p2 = por %p1613_p3, %p1612_p13 }
  0xc8   : > { %p1615_p5 = pnand %p1614_p2, %p1608_p10 }
  0xca   : > { %1618 = shalt.err (!%p1615_p5)
}
  0xcb   : > { %s1619_s19 = scalar_lea.vmem %s347_s9, 128  ;;  %s1777_s27 = smov [#allocation14]  }
  0xcc   : > { %p1620_p7 = scmp.ne.s32.totalorder %s347_s9, %s1619_s19  ;;  %s1624_s24 = sshll.u32 %s1777_s27, 4  ;;  %s1625_s24 = int_to_ptr.vmem [resolvable:$false] %s1624_s24 }
  0xcd   : > { %s1626_s22 = scalar_lea.vmem %s1625_s24, 256  ;;  %p1627_p8 = scmp.lt.s32.totalorder %s347_s9, %s1625_s24 }
  0xce   : > { %p1622_p0 = pnand %p1620_p7, %p2394_p4  ;;  %p1628_p11 = scmp.lt.s32.totalorder %s1626_s22, %s1619_s19 }
  0xd0   : > { %p1623_p1 = pneg %p1622_p0  ;;  %p1629_p9 = por %p1628_p11, %p1627_p8 }
  0xd2   : > { %p1630_p6 = pnand %p1629_p9, %p1623_p1 }
  0xd4   : > { %1633 = shalt.err (!%p1630_p6)
}
  0xd5   : > { %p2397_p12 = scmp.ne.s32.totalorder %s2365_s16, 0  ;;  %s2398_s8 = sld [smem:[#allocation28_spill]] }
  0xd6   : > { %s2399_s30 = sld [smem:[#allocation32_spill]] }
  0xdb   : > { %1343 = dma.hbm_to_vmem [thread:$0]  (!%p2397_p12), %s344_s11, 128, %s347_s9, %s2398_s8  }
  0xdc   : > { %p2400_p10 = scmp.ne.s32.totalorder %s2399_s30, 0 }
  0xdd   : > { %s2401_s13 = sld [smem:[#allocation29_spill]] (!%p2400_p10)  ;;  %s2179_s20 = sand.u32 (!%p2400_p10), 1, %s1744_s25  }
  0xde   : > { %355 = sbr.rel (%p2400_p10) target bundleno = 1513 (0x5e9), region = 44  ;;  %s1197_s10 = sshll.u32 (!%p2400_p10), %s2179_s20, 3 }
  0xdf   : > { %s358_s15 = scalar_lea.sflag (!%p2400_p10), [#allocation7], %s2179_s20  ;;  %s2183_s1 = scalar_lea.vmem (!%p2400_p10), [#allocation6], %s1197_s10 }
  0xe3   : > { %p2402_p11 = scmp.ne.s32.totalorder (!%p2400_p10), %s2401_s13, 0 }
  0xe5   : > { %1707 = dma.done.wait (%p2402_p11), %s358_s15, 128  }
  0xe6   : > { %1709 = vsyncadd (%p2402_p11), %s358_s15, 4294967168  ;;  %s2403_s16 = sld [smem:[#allocation23_spill]]  ;;  %s2404_s9 = sld [smem:[#allocation30_spill]] }
  0xe7   : > { %s366_s11 = sand.u32 1, %s1979_s18  }
  0xe8   : > { %s367_s5 = scalar_lea.sflag [#allocation10], %s366_s11 }
  0xec   : > { %s368_s17 = sand.u32 1, %s2403_s16   ;;  %p2405_p4 = scmp.ne.s32.totalorder %s2404_s9, 0 }
  0xed   : > { %s1198_s3 = sshll.u32 %s368_s17, 5 }
  0xee   : > { %s370_s12 = scalar_lea.vmem [#allocation9], %s1198_s3 }
  0xef   : > { %1711 = dma.done.wait (%p2405_p4), %s367_s5, 1024  }
  0xf0   : > { %1713 = vsyncadd (%p2405_p4), %s367_s5, 4294966272  ;;  %s2195_s21 = scalar_lea.vmem [#allocation11], %s1198_s3  ;;  %s385_s28 = scalar_lea.sflag [#allocation13], %s366_s11 }
  0xf1   : > { %s2197_s19 = scalar_lea.vmem [#allocation12], %s1198_s3 }
  0xf2   : > { %1715 = dma.done.wait (%p2405_p4), %s385_s28, 640  }
  0xf3   : > { %1717 = vsyncadd (%p2405_p4), %s385_s28, 4294966656  ;;  %s2203_s27 = sshll.u32 %s368_s17, 3  ;;  %p2406_p9 = scmp.eq.s32.totalorder %s1979_s18, 0 }
  0xf4   : > { %s397_s24 = scalar_lea.vmem [#allocation14], %s2203_s27 }
  0xf5   : > { %1719 = dma.done.wait (%p2406_p9), [#allocation16], 16   ;;  %p2407_p13 = pmov %p2406_p9 }
  0xf6   : > { %s2408_s22 = sld [smem:[#allocation25_spill]]  ;;  %s2211_s8 = scalar_lea.vmem [#allocation17], %s1197_s10 }
  0xf7   : > { %1721 = vsyncadd (%p2407_p13), [#allocation16], 4294967280 }
  0xfc   : > { %p450_p3 = scmp.eq.s32.totalorder %s2408_s22, 0 }
  0xfd   : > { %v1205_v0 = vld [vmem:[#allocation15] ss:$0 sm:$0xff] (%p450_p3)  ;;  %vm463_vm0 = vcmask (%p450_p3), 261120  }
  0xfe   : > { %455 = sbr.rel (!%p450_p3) target bundleno = 261 (0x105), region = 72  ;;  %464 = vst.msk [vmem:[%s2211_s8] sm:$0xff] (%p450_p3), %vm463_vm0, %v1205_v0 }
 0x105 PF: > { %v469_v1 = vld [vmem:[%s370_s12] sm:$0xff]  ;;  %v470_v2 = vld [vmem:[%s370_s12 + $0x8] sm:$0xff]  ;;  %v1778_v4 = vmov 0.0|0.0   ;;  %v471_v7 = vld [vmem:[%s370_s12 + $0x10] sm:$0xff]  ;;  %vm1779_vm1 = vmmov 0   ;;  %v1780_v10 = vmov 0.0  }
 0x106   : > { %v556_v3 = vld [vmem:[%s2195_s21] sm:$0xff]  ;;  %1290 = vmatprep.subr.bf16.mxu0 %v1778_v4  ;;  %v1291_v5 = vpack.c.bf16 %v470_v2, %v469_v1  ;;  %1296 = vmatprep.subr.bf16.mxu1 %v1778_v4  ;;  %v557_v6 = vld [vmem:[%s2195_s21 + $0x8] sm:$0xff]  ;;  %v472_v8 = vld [vmem:[%s370_s12 + $0x18] sm:$0xff]  ;;  %vm473_vm2 = vcmask 261120   ;;  %vm547_vm3 = vcmask 64512   ;;  %vm549_vm4 = vcmask 7168  }
 0x107   : > { %v1297_v9 = vpack.c.bf16 %v557_v6, %v556_v3  ;;  %1250 = vmatprep.mubr.msk.f32.mxu0 %vm1779_vm1, %v1780_v10  ;;  %v558_v11 = vld [vmem:[%s2195_s21 + $0x10] sm:$0xff]  ;;  %v559_v12 = vld [vmem:[%s2195_s21 + $0x18] sm:$0xff]  ;;  %1261 = vmatprep.mubr.msk.f32.mxu1 %vm1779_vm1, %v1780_v10  ;;  %v1294_v13 = vpack.c.bf16 %v472_v8, %v471_v7  ;;  %552 = vst.msk [vmem:[#allocation5] sm:$0xff] %vm547_vm3, %v1780_v10  ;;  %v634_v21 = vld [vmem:[%s2197_s19] sm:$0xff]  ;;  %v1781_v26 = vmov -inf   ;;  %v1782_v31 = vmov 0  }
 0x108   : > { %1292 = vmatpush3.bf16.msra.mxu0 %v1291_v5  ;;  %v1300_v14 = vpack.c.bf16 %v559_v12, %v558_v11  ;;  %v468_v15 = vld [vmem:[%s2183_s1] sm:$0xff]  ;;  %v635_v22 = vld [vmem:[%s2197_s19 + $0x8] sm:$0xff]  ;;  %550 = vst.msk [vmem:[#allocation3] sm:$0xff] %vm549_vm4, %v1781_v26  ;;  %551 = vst.msk [vmem:[#allocation4] sm:$0xff] %vm549_vm4, %v1780_v10  ;;  %1448 = vset.pattern.permute.xlu0 %v1782_v31  ;;  %s2409_s18 = sld [smem:[#allocation26_spill]]  ;;  %s996_s13 = sshll.u32 %s2211_s8, 4  ;;  %s2255_s13 = int_to_ptr.vmem [resolvable:$true] %s996_s13 }
 0x109   : > { %1293 = vmatprep.subr.bf16.mxu0 %v1778_v4  ;;  %1298 = vmatpush3.bf16.msra.mxu1 %v1297_v9  ;;  %v636_v23 = vld [vmem:[%s2197_s19 + $0x10] sm:$0xff]  ;;  %v1303_v24 = vpack.c.bf16 %v635_v22, %v634_v21  ;;  %v637_v25 = vld [vmem:[%s2197_s19 + $0x18] sm:$0xff]  ;;  %v905_v45 = vld [vmem:[%s397_s24] sm:$0xff]  ;;  %s2410_s1 = sld [smem:[#allocation39_spill]]  ;;  %s983_s9 = scalar_lea.sflag [#allocation8], %s2179_s20 }
 0x10a   : > { %1299 = vmatprep.subr.bf16.mxu1 %v1778_v4  ;;  %v1306_v27 = vpack.c.bf16 %v637_v25, %v636_v23  ;;  %1449 = vset.pattern.permute.xlu1 %v1782_v31  ;;  %v979_v61 = vld [vmem:[%s2211_s8] sm:$0xff]  ;;  %s1634_s11 = scalar_lea.vmem %s2255_s13, 128  ;;  %p2411_p5 = scmp.ne.s32.totalorder %s2387_s6, 0 }
 0x10b   : > { %p1635_p2 = scmp.ne.s32.totalorder %s2255_s13, %s1634_s11  ;;  %s1783_s17 = smov [#allocation17]  }
 0x10c   : > { %1295 = vmatpush3.bf16.msra.mxu0 %v1294_v13  ;;  %s1638_s3 = sshll.u32 %s1783_s17, 4  ;;  %s1639_s3 = int_to_ptr.vmem [resolvable:$false] %s1638_s3 }
 0x10d   : > { %1301 = vmatpush3.bf16.msra.mxu1 %v1300_v14  ;;  %1302 = vmatprep.subr.bf16.mxu0 %v1778_v4  ;;  %p1636_p7 = pnand %p1635_p2, %p2411_p5  ;;  %s1640_s5 = scalar_lea.vmem %s1639_s3, 256 }
 0x10e   : > { %1275 = vmatprep.subr.mxu1 %v1780_v10  ;;  %v810_v52 = vld [vmem:[#allocation5] sm:$0xff]  ;;  %s1214_s30 = sshll.u32 %s2409_s18, 7  ;;  %p1641_p1 = scmp.lt.s32.totalorder %s2255_s13, %s1639_s3 }
 0x10f   : > { %1251 = vmatmul.mubr.msk.f32.vlgmr.msra.gmra.mrb[0].mxu0 %vm473_vm2, %v468_v15  ;;  %v786_v32 = vld [vmem:[#allocation3] sm:$0xff]  ;;  %v802_v46 = vld [vmem:[#allocation4] sm:$0xff]  ;;  %s2253_s16 = scalar_lea.hbm %s2410_s1, %s1214_s30  ;;  %p1637_p0 = pneg %p1636_p7 }
 0x110   : > { %1262 = vmatmul.mubr.msk.f32.vlgmr.msra.gmra.mrb[0].mxu1 %vm473_vm2, %v468_v15  ;;  %1272 = vmatprep.mubr.msk.f32.mxu0 %vm1779_vm1, %v1780_v10  ;;  %p1642_p8 = scmp.lt.s32.totalorder %s1640_s5, %s1634_s11 }
 0x111   : > { %1277 = vmatprep.mubr.msk.f32.mxu1 %vm1779_vm1, %v1780_v10  ;;  %1304 = vmatpush3.bf16.msra.mxu0 %v1303_v24 }
 0x112   : > { %1305 = vmatprep.subr.bf16.mxu0 %v1778_v4  ;;  %p1643_p6 = por %p1642_p8, %p1641_p1 }
 0x114   : > { %p1644_p12 = pnand %p1643_p6, %p1637_p0 }
 0x115   : > { %1307 = vmatpush3.bf16.msra.mxu0 %v1306_v27 }
 0x116   : > { %1285 = vmatprep.subr.mxu0 %v1780_v10 }
 0x118   : > { %1273 = vmatmul.mubr.msk.f32.vlgmr.msra.gmra.mrb[2].mxu0 %vm473_vm2, %v468_v15 }
 0x119   : > { %1287 = vmatprep.mubr.msk.f32.mxu0 %vm1779_vm1, %v1780_v10  ;;  %1286 = vmatpush3.msra.mxu0 %v905_v45 }
 0x1e2   : > { %v543_v16 = vpop.f32.mrb[0].mxu0 }
 0x1e3   : > { %548 = vst.msk [vmem:[#allocation2] sm:$0xff] %vm547_vm3, %v543_v16  ;;  %v1252_v17 = vpop.f32.mrb[1].mxu0  ;;  %v630_v18 = vpop.f32.mrb[0].mxu1 }
 0x1e4   : > { %v1263_v19 = vpop.f32.mrb[1].mxu1  ;;  %1276 = vmatpush3.xpose.msk.msra.mxu1 %vm547_vm3, %v630_v18 }
 0x1e5   : > { %1280 = vmatprep.subr.mxu1 %v1780_v10 }
 0x1ea   : > { %v708_v20 = vld [vmem:[#allocation2] sm:$0xff] }
 0x1eb   : > { %1278 = vmatmul.mubr.msk.f32.vlgmr.msra.gmra.mrb[2].mxu1 %vm547_vm3, %v708_v20  ;;  %v704_v36 = vpop.f32.mrb[2].mxu0 }
 0x1ec   : > { %1282 = vmatprep.mubr.msk.f32.mxu1 %vm1779_vm1, %v1780_v10  ;;  %1281 = vmatpush3.msra.mxu1 %v704_v36  ;;  %v1274_v37 = vpop.f32.mrb[3].mxu0 }
 0x2be   : > { %v782_v28 = vpop.f32.mrb[2].mxu1 }
 0x2bf   : > { %v1279_v29 = vpop.f32.mrb[3].mxu1  ;;  %v787_v30 = vsel %vm547_vm3, %v782_v28, -inf }
 0x2c0   : > { %788 = vmax.xlane.f32.xlu0 %v787_v30 }
 0x34d   : > { %v789_v33 = vpop.xlane.xlu0 %788 }
 0x34e   : > { %v790_v34 = vmax.f32 %v786_v32, %v789_v33 }
 0x350   : > { %v791_v35 = vsub.f32 %v786_v32, %v790_v34  ;;  %892 = vst.msk [vmem:[#allocation3] sm:$0xff] %vm549_vm4, %v790_v34  ;;  %796 = vperm.xlu0 %1448, %v790_v34  }
 0x352   : > { %v792_v43 = vmul.f32 1.442695, %v791_v35 }
 0x3cf   : > { %v797_v38 = vpop.permute.xlu0 %796 }
 0x3d0   : > { %v799_v39 = vsub.f32 %v782_v28, %v797_v38 }
 0x3d2   : > { %v800_v40 = vmul.f32 1.442695, %v799_v39 }
 0x3d4   : > { %1450 = vpow2.f32 %v800_v40 }
 0x3d5   : > { %1452 = vpow2.f32 %v792_v43 }
 0x3de   : > { %v1451_v41 = vpop.eup %1450 }
 0x3df   : > { %1283 = vmatmul.mubr.msk.f32.vlgmr.msra.gmra.mrb[4].mxu1 %vm547_vm3, %v1451_v41  ;;  %v804_v42 = vsel %vm547_vm3, %v1451_v41, 0.0  ;;  %v1453_v44 = vpop.eup %1452 }
 0x3e0   : > { %805 = vadd.xlane.f32.xlu1 %v804_v42  ;;  %v803_v47 = vmul.f32 %v1453_v44, %v802_v46 }
 0x3f1   : > { %813 = vperm.xlu1 %1449, %v1453_v44  }
 0x46d   : > { %v806_v48 = vpop.xlane.xlu1 %805 }
 0x46e   : > { %v807_v49 = vadd.f32 %v806_v48, %v803_v47 }
 0x470   : > { %809 = vst.msk [vmem:[#allocation4] sm:$0xff] %vm549_vm4, %v807_v49 }
 0x471   : > { %v814_v53 = vpop.permute.xlu1 %813 }
 0x472   : > { %v816_v54 = vmul.f32 %v814_v53, %v810_v52 }
 0x477   : > { %v897_v50 = vld [vmem:[#allocation4] sm:$0xff] }
 0x478   : > { %1454 = vrcp.f32 %v897_v50 }
 0x482   : > { %v1455_v51 = vpop.eup %1454 }
 0x483   : > { %901 = vperm.xlu1 %1449, %v1455_v51  }
 0x4b2   : > { %v886_v55 = vpop.f32.mrb[4].mxu1 }
 0x4b3   : > { %v890_v56 = vadd.f32 %v886_v55, %v816_v54  ;;  %v1284_v57 = vpop.f32.mrb[5].mxu1 }
 0x4b5   : > { %891 = vst.msk [vmem:[#allocation5] sm:$0xff] %vm547_vm3, %v890_v56 }
 0x4bc   : > { %v896_v59 = vld [vmem:[#allocation5] sm:$0xff] }
 0x502   : > { %v902_v58 = vpop.permute.xlu1 %901 }
 0x503   : > { %v904_v60 = vmul.f32 %v902_v58, %v896_v59 }
 0x505   : > { %1288 = vmatmul.mubr.msk.f32.vlgmr.msra.gmra.mrb[4].mxu0 %vm547_vm3, %v904_v60 }
 0x5d8   : > { %v975_v62 = vpop.f32.mrb[4].mxu0 }
 0x5d9   : > { %v980_v63 = vadd.f32 %v979_v61, %v975_v62  ;;  %v1289_v0 = vpop.f32.mrb[5].mxu0 }
 0x5db   : > { %981 = vst.msk [vmem:[%s2211_s8] sm:$0xff] %vm473_vm2, %v980_v63 }
 0x5dc   : > { %1647 = shalt.err (!%p1644_p12)
}
 0x5dd   : > { %s1648_s20 = scalar_lea.hbm %s2253_s16, 128  ;;  %s1652_s28 = scalar_lea.hbm %s2410_s1, 256 }
 0x5de   : > { %p1649_p10 = scmp.ne.s32.totalorder %s2253_s16, %s1648_s20  ;;  %p1653_p9 = scmp.lt.u32.totalorder %s2253_s16, %s2410_s1 }
 0x5df   : > { %p1654_p13 = scmp.lt.u32.totalorder %s1652_s28, %s1648_s20  ;;  %p1656_p2 = scmp.lt.u32.totalorder %s1648_s20, %s2253_s16 }
 0x5e0   : > { %p1650_p11 = pnand %p1649_p10, %p2411_p5 }
 0x5e1   : > { %p1655_p3 = por %p1654_p13, %p1653_p9 }
 0x5e2   : > { %p1651_p4 = pneg %p1650_p11 }
 0x5e3   : > { %p1657_p7 = por %p1656_p2, %p1655_p3 }
 0x5e5   : > { %p1658_p0 = pnand %p1657_p7, %p1651_p4 }
 0x5e7   : > { %1661 = shalt.err (!%p1658_p0)
}
 0x5e8   : > { %1322 = dma.vmem_to_hbm [thread:$0]  (%p2411_p5), %s2255_s13, 128, %s2253_s16, %s983_s9  }
 0x5e9 PF: > { %s2412_s24 = sld [smem:[#allocation24_spill]]  ;;  %s2413_s22 = sld [smem:[#allocation31_spill]] }
 0x5ea   : > { %p1351_p1 = scmp.ge.s32.totalorder %s1768_s7, 2 }
 0x5ef   : > { %s1008_s8 = sand.u32 1, %s2412_s24   ;;  %p2414_p8 = scmp.ne.s32.totalorder %s2413_s22, 0 }
 0x5f0   : > { %s1009_s18 = scalar_lea.sflag [#allocation8], %s1008_s8 }
 0x5f1   : > { %p1345_p6 = pnand %p1351_p1, %p2414_p8 }
 0x5f3   : > { %1723 = dma.done.wait (!%p1345_p6), %s1009_s18, 128  }
 0x5f4   : > { %1725 = vsyncadd (!%p1345_p6), %s1009_s18, 4294967168  ;;  %s29_s7 = sadd.s32 1, %s1768_s7   ;;  %s2415_s21 = sld [smem:[#allocation23_spill]] }
 0x5f5   : > { %p26_p12 = scmp.ge.s32.totalorder %s29_s7, 10   ;;  %s2416_s6 = sld [smem:[#allocation35_spill]] }
 0x5f6   : > { %s2417_s28 = sld [smem:[#allocation27_spill]]  ;;  %s2418_s30 = sld [smem:[#allocation33_spill]] }
 0x5f7   : > { %s2419_s13 = sld [smem:[#allocation34_spill]]  ;;  %s2420_s22 = smov %s1736_s23 }
 0x5f8   : > { %s2421_s23 = smov %s2069_s14  ;;  %s2422_s24 = smov %s1744_s25 }
 0x5f9   : > { %s2423_s25 = smov %s1748_s26  ;;  %s2425_s27 = smov %s1760_s29 }
 0x5fa   :  { %28 = sbr.rel (!%p26_p12) target bundleno = 19 (0x13), region = 154 }
 0x5fb   : > { %s2424_s26 = smov %s2416_s6 }
 0x5fc   : > { %s2426_s29 = smov %s2418_s30 }
 0x5fd   : > { %s2427_s30 = smov %s2419_s13 }
 0x601   :  { %1014 = vsyncpa [#allocation7], 1 }
 0x602   :  { %1016 = vsyncpa [#allocation7 + $0x1], 1 }
 0x603   :  { %1017 = vsyncpa [#allocation10], 1 }
 0x604   :  { %1019 = vsyncpa [#allocation10 + $0x1], 1 }
 0x605   :  { %1020 = vsyncpa [#allocation13], 1 }
 0x606   :  { %1022 = vsyncpa [#allocation13 + $0x1], 1 }
 0x607   :  { %1023 = vsyncpa [#allocation16], 1 }
 0x608   :  { %1024 = vsyncpa [#allocation8], 1 }
 0x609   :  { %1026 = vsyncpa [#allocation8 + $0x1], 1 }

</bundles_post_ra>
